<compile_context>
chip_gen: v7x
topology: tpu7x:2x2x1
jax: 0.10.0
libtpu: 0.0.40
codegen_flags: <defaults>
</compile_context>

<pallas_src>
import jax
import jax.numpy as jnp
from jax.experimental import pallas as pl
from jax.experimental.pallas import tpu as pltpu


def _round_up(x, m):
    return ((x + m - 1) // m) * m


def ensemble_mlp_kernel(x_ref,
                        w1_ref, b1_ref,
                        w2_ref, b2_ref,
                        w3_ref, b3_ref,
                        w4_ref, b4_ref,
                        o_ref):
    # dropout(p=0.5, training=False) is identity -> omitted (eval mode).
    # Cast f32 input to bf16 in-kernel (hides under DMA/matmul).
    x = x_ref[...].astype(jnp.bfloat16)

    # fc1 + relu
    h = jnp.dot(x, w1_ref[...], preferred_element_type=jnp.float32) + b1_ref[...]
    h = jnp.maximum(h, 0.0)

    # fc2 + relu
    h = jnp.dot(h.astype(jnp.bfloat16), w2_ref[...],
                preferred_element_type=jnp.float32) + b2_ref[...]
    h = jnp.maximum(h, 0.0)

    # fc3 + relu
    h = jnp.dot(h.astype(jnp.bfloat16), w3_ref[...],
                preferred_element_type=jnp.float32) + b3_ref[...]
    h = jnp.maximum(h, 0.0)

    # fc4 (output lane-padded to 128 columns; padded columns carry a -1e30
    # f32 bias so they contribute 0 to the softmax -- b4 must stay f32).
    logits = jnp.dot(h.astype(jnp.bfloat16), w4_ref[...],
                     preferred_element_type=jnp.float32) + b4_ref[...]

    # softmax over dim=1 (last axis of the 2-D batch)
    m = jnp.max(logits, axis=-1, keepdims=True)
    e = jnp.exp(logits - m)
    denom = jnp.sum(e, axis=-1, keepdims=True)
    o_ref[...] = (e * pl.reciprocal(denom, approx=True)).astype(o_ref.dtype)


def ensemble_model_forward(x, kernel_params, output_size, *, block_b=4096):
    """x: (B, input_size) f32; kernel_params from prepare_kernel_params."""
    B, in_size = x.shape
    out_pad = kernel_params["w4"].shape[1]

    # Pad only to the sublane multiple (16 keeps bf16 lhs/out packing unmasked).
    B_pad = _round_up(B, 16)
    if B_pad != B:
        x = jnp.pad(x, ((0, B_pad - B), (0, 0)))

    # Batch tile: as large as block_b (few grid steps -> less per-step
    # overhead) but split into >=2 blocks when possible so v7x megacore
    # shards the batch across both TensorCores.
    TB = min(block_b, max(16, _round_up(pl.cdiv(B_pad, 2), 16)))
    grid_b = pl.cdiv(B_pad, TB)   # last block may be partial; rows independent

    const2 = lambda i: (0, 0)

    def resident(a):
        # Whole array, constant index map -> DMA'd once, stays VMEM-resident.
        return pl.BlockSpec(a.shape, const2)

    out = pl.pallas_call(
        ensemble_mlp_kernel,
        out_shape=jax.ShapeDtypeStruct((B_pad, out_pad), jnp.bfloat16),
        grid=(grid_b,),
        in_specs=[
            pl.BlockSpec((TB, in_size), lambda i: (i, 0)),
            resident(kernel_params["w1"]), resident(kernel_params["b1"]),
            resident(kernel_params["w2"]), resident(kernel_params["b2"]),
            resident(kernel_params["w3"]), resident(kernel_params["b3"]),
            resident(kernel_params["w4"]), resident(kernel_params["b4"]),
        ],
        out_specs=pl.BlockSpec((TB, out_pad), lambda i: (i, 0)),
        compiler_params=pltpu.CompilerParams(
            dimension_semantics=("parallel",),  # megacore sharding on v7x
        ),
    )(x,
      kernel_params["w1"], kernel_params["b1"],
      kernel_params["w2"], kernel_params["b2"],
      kernel_params["w3"], kernel_params["b3"],
      kernel_params["w4"], kernel_params["b4"])

    # Slice on the bf16 output (half the HBM read of an f32 slice); the cast
    # of the tiny (B, output_size) result back to f32 is negligible.
    return out[:B, :output_size].astype(jnp.float32)


def init_params(key, input_size, hidden_size, output_size):
    """Deterministic f32 init. Weights stored transposed: (in, out). Biases: (1, out)."""
    dims = [
        (input_size, hidden_size * 3),
        (hidden_size * 3, hidden_size * 2),
        (hidden_size * 2, hidden_size),
        (hidden_size, output_size),
    ]
    params = {}
    for i, (fan_in, fan_out) in enumerate(dims, start=1):
        key, kw, kb = jax.random.split(key, 3)
        bound = 1.0 / (fan_in ** 0.5)  # matches PyTorch Linear default init range
        params[f"w{i}"] = jax.random.uniform(
            kw, (fan_in, fan_out), jnp.float32, minval=-bound, maxval=bound)
        params[f"b{i}"] = jax.random.uniform(
            kb, (1, fan_out), jnp.float32, minval=-bound, maxval=bound)
    return params


def prepare_kernel_params(params, output_size):
    """bf16 weights, f32 biases; pad fc4 to a lane-dense (>=128) output width."""
    out_pad = _round_up(max(output_size, 128), 128)
    kp = {}
    for i in (1, 2, 3):
        kp[f"w{i}"] = params[f"w{i}"].astype(jnp.bfloat16)
        kp[f"b{i}"] = params[f"b{i}"].astype(jnp.float32)
    hidden = params["w4"].shape[0]
    w4p = jnp.zeros((hidden, out_pad), jnp.float32).at[:, :output_size].set(params["w4"])
    # Must remain f32 (-1e30 in bf16 becomes -inf; exp still 0, but keep f32).
    b4p = jnp.full((1, out_pad), -1e30, jnp.float32).at[:, :output_size].set(params["b4"])
    kp["w4"] = w4p.astype(jnp.bfloat16)
    kp["b4"] = b4p
    return kp


def reference_forward(x, params):
    """Plain-JAX f32 reference for sanity checking."""
    h = jnp.maximum(x @ params["w1"] + params["b1"], 0.0)
    h = jnp.maximum(h @ params["w2"] + params["b2"], 0.0)
    h = jnp.maximum(h @ params["w3"] + params["b3"], 0.0)
    logits = h @ params["w4"] + params["b4"]
    return jax.nn.softmax(logits, axis=1)


if __name__ == "__main__":
    input_size, hidden_size, output_size = 32, 32, 16
    batch = 8

    key = jax.random.PRNGKey(0)
    key, kx, kx2 = jax.random.split(key, 3)
    x = jax.random.normal(kx, (batch, input_size), jnp.float32)
    params = init_params(key, input_size, hidden_size, output_size)
    kparams = prepare_kernel_params(params, output_size)

    # Small case (single grid step, sublane-only padding).
    out = jax.block_until_ready(ensemble_model_forward(x, kparams, output_size))
    ref = reference_forward(x, params)
    assert out.shape == (batch, output_size)
    # bf16 matmuls/output + approx reciprocal -> loosened tolerance vs f32 ref.
    assert jnp.allclose(out, ref, atol=4e-2, rtol=0), "mismatch vs f32 reference"
    assert jnp.allclose(jnp.sum(out, axis=1), jnp.ones((batch,)), atol=2e-2)

    # Larger batch exercises the 2-block (megacore-splittable) cdiv grid with a
    # partial last block.
    big_b = 1000
    xb = jax.random.normal(kx2, (big_b, input_size), jnp.float32)
    out_b = jax.block_until_ready(ensemble_model_forward(xb, kparams, output_size))
    ref_b = reference_forward(xb, params)
    assert out_b.shape == (big_b, output_size)
    assert jnp.allclose(out_b, ref_b, atol=4e-2, rtol=0), "mismatch (large batch)"
    assert jnp.allclose(jnp.sum(out_b, axis=1), jnp.ones((big_b,)), atol=2e-2)

    print("KERNEL_OK")
</pallas_src>

<mosaic_0001>
module attributes {stable_mosaic.version = 11 : i64} {
  func.func @ensemble_mlp_kernel(%arg0: i32, %arg1: memref<16x32xf32, #tpu.memory_space<vmem>>, %arg2: memref<32x96xbf16, #tpu.memory_space<vmem>>, %arg3: memref<1x96xf32, #tpu.memory_space<vmem>>, %arg4: memref<96x64xbf16, #tpu.memory_space<vmem>>, %arg5: memref<1x64xf32, #tpu.memory_space<vmem>>, %arg6: memref<64x32xbf16, #tpu.memory_space<vmem>>, %arg7: memref<1x32xf32, #tpu.memory_space<vmem>>, %arg8: memref<32x128xbf16, #tpu.memory_space<vmem>>, %arg9: memref<1x128xf32, #tpu.memory_space<vmem>>, %arg10: memref<16x128xbf16, #tpu.memory_space<vmem>>) attributes {dimension_semantics = [#tpu.dimension_semantics<parallel>], iteration_bounds = array<i64: 1>, scalar_prefetch = 0 : i64, scratch_operands = 0 : i64, tpu.core_type = #tpu.core_type<tc>, window_params = [{transform_indices = @transform_0, window_bounds = array<i64: 16, 32>}, {pipeline_mode = #tpu.pipeline_mode<synchronous>, transform_indices = @transform_1, window_bounds = array<i64: 32, 96>}, {pipeline_mode = #tpu.pipeline_mode<synchronous>, transform_indices = @transform_2, window_bounds = array<i64: 1, 96>}, {pipeline_mode = #tpu.pipeline_mode<synchronous>, transform_indices = @transform_3, window_bounds = array<i64: 96, 64>}, {pipeline_mode = #tpu.pipeline_mode<synchronous>, transform_indices = @transform_4, window_bounds = array<i64: 1, 64>}, {pipeline_mode = #tpu.pipeline_mode<synchronous>, transform_indices = @transform_5, window_bounds = array<i64: 64, 32>}, {pipeline_mode = #tpu.pipeline_mode<synchronous>, transform_indices = @transform_6, window_bounds = array<i64: 1, 32>}, {pipeline_mode = #tpu.pipeline_mode<synchronous>, transform_indices = @transform_7, window_bounds = array<i64: 32, 128>}, {pipeline_mode = #tpu.pipeline_mode<synchronous>, transform_indices = @transform_8, window_bounds = array<i64: 1, 128>}, {transform_indices = @transform_9, window_bounds = array<i64: 16, 128>}]} {
    %c0 = arith.constant 0 : index
    %c0_0 = arith.constant 0 : index
    %0 = vector.load %arg1[%c0, %c0_0] : memref<16x32xf32, #tpu.memory_space<vmem>>, vector<16x32xf32>
    %1 = arith.truncf %0 : vector<16x32xf32> to vector<16x32xbf16>
    %c0_1 = arith.constant 0 : index
    %c0_2 = arith.constant 0 : index
    %2 = vector.load %arg2[%c0_1, %c0_2] : memref<32x96xbf16, #tpu.memory_space<vmem>>, vector<32x96xbf16>
    %cst = arith.constant dense<0.000000e+00> : vector<16x96xf32>
    %3 = tpu.matmul %1, %2, %cst {dimension_numbers = #tpu.dot_dimension_numbers<[1], [0], [0], [1], [0, 0, 1, 1], [], []>} : vector<16x32xbf16>, vector<32x96xbf16>, vector<16x96xf32> -> vector<16x96xf32>
    %c0_3 = arith.constant 0 : index
    %c0_4 = arith.constant 0 : index
    %4 = vector.load %arg3[%c0_3, %c0_4] : memref<1x96xf32, #tpu.memory_space<vmem>>, vector<1x96xf32>
    %5 = vector.broadcast %4 : vector<1x96xf32> to vector<16x96xf32>
    %6 = arith.addf %3, %5 : vector<16x96xf32>
    %cst_5 = arith.constant 0.000000e+00 : f32
    %7 = vector.broadcast %cst_5 : f32 to vector<16x96xf32>
    %8 = arith.maximumf %6, %7 : vector<16x96xf32>
    %9 = arith.truncf %8 : vector<16x96xf32> to vector<16x96xbf16>
    %c0_6 = arith.constant 0 : index
    %c0_7 = arith.constant 0 : index
    %10 = vector.load %arg4[%c0_6, %c0_7] : memref<96x64xbf16, #tpu.memory_space<vmem>>, vector<96x64xbf16>
    %cst_8 = arith.constant dense<0.000000e+00> : vector<16x64xf32>
    %11 = tpu.matmul %9, %10, %cst_8 {dimension_numbers = #tpu.dot_dimension_numbers<[1], [0], [0], [1], [0, 0, 1, 1], [], []>} : vector<16x96xbf16>, vector<96x64xbf16>, vector<16x64xf32> -> vector<16x64xf32>
    %c0_9 = arith.constant 0 : index
    %c0_10 = arith.constant 0 : index
    %12 = vector.load %arg5[%c0_9, %c0_10] : memref<1x64xf32, #tpu.memory_space<vmem>>, vector<1x64xf32>
    %13 = vector.broadcast %12 : vector<1x64xf32> to vector<16x64xf32>
    %14 = arith.addf %11, %13 : vector<16x64xf32>
    %cst_11 = arith.constant 0.000000e+00 : f32
    %15 = vector.broadcast %cst_11 : f32 to vector<16x64xf32>
    %16 = arith.maximumf %14, %15 : vector<16x64xf32>
    %17 = arith.truncf %16 : vector<16x64xf32> to vector<16x64xbf16>
    %c0_12 = arith.constant 0 : index
    %c0_13 = arith.constant 0 : index
    %18 = vector.load %arg6[%c0_12, %c0_13] : memref<64x32xbf16, #tpu.memory_space<vmem>>, vector<64x32xbf16>
    %cst_14 = arith.constant dense<0.000000e+00> : vector<16x32xf32>
    %19 = tpu.matmul %17, %18, %cst_14 {dimension_numbers = #tpu.dot_dimension_numbers<[1], [0], [0], [1], [0, 0, 1, 1], [], []>} : vector<16x64xbf16>, vector<64x32xbf16>, vector<16x32xf32> -> vector<16x32xf32>
    %c0_15 = arith.constant 0 : index
    %c0_16 = arith.constant 0 : index
    %20 = vector.load %arg7[%c0_15, %c0_16] : memref<1x32xf32, #tpu.memory_space<vmem>>, vector<1x32xf32>
    %21 = vector.broadcast %20 : vector<1x32xf32> to vector<16x32xf32>
    %22 = arith.addf %19, %21 : vector<16x32xf32>
    %cst_17 = arith.constant 0.000000e+00 : f32
    %23 = vector.broadcast %cst_17 : f32 to vector<16x32xf32>
    %24 = arith.maximumf %22, %23 : vector<16x32xf32>
    %25 = arith.truncf %24 : vector<16x32xf32> to vector<16x32xbf16>
    %c0_18 = arith.constant 0 : index
    %c0_19 = arith.constant 0 : index
    %26 = vector.load %arg8[%c0_18, %c0_19] : memref<32x128xbf16, #tpu.memory_space<vmem>>, vector<32x128xbf16>
    %cst_20 = arith.constant dense<0.000000e+00> : vector<16x128xf32>
    %27 = tpu.matmul %25, %26, %cst_20 {dimension_numbers = #tpu.dot_dimension_numbers<[1], [0], [0], [1], [0, 0, 1, 1], [], []>} : vector<16x32xbf16>, vector<32x128xbf16>, vector<16x128xf32> -> vector<16x128xf32>
    %c0_21 = arith.constant 0 : index
    %c0_22 = arith.constant 0 : index
    %28 = vector.load %arg9[%c0_21, %c0_22] : memref<1x128xf32, #tpu.memory_space<vmem>>, vector<1x128xf32>
    %29 = vector.broadcast %28 : vector<1x128xf32> to vector<16x128xf32>
    %30 = arith.addf %27, %29 : vector<16x128xf32>
    %cst_23 = arith.constant dense<0xFF800000> : vector<16xf32>
    %31 = vector.multi_reduction <maximumf>, %30, %cst_23 [1] : vector<16x128xf32> to vector<16xf32>
    %32 = vector.shape_cast %31 : vector<16xf32> to vector<16x1xf32>
    %33 = vector.broadcast %32 : vector<16x1xf32> to vector<16x128xf32>
    %34 = arith.subf %30, %33 : vector<16x128xf32>
    %35 = math.exp %34 : vector<16x128xf32>
    %cst_24 = arith.constant dense<0.000000e+00> : vector<16xf32>
    %36 = vector.multi_reduction <add>, %35, %cst_24 [1] : vector<16x128xf32> to vector<16xf32>
    %37 = vector.shape_cast %36 : vector<16xf32> to vector<16x1xf32>
    %38 = tpu.reciprocal %37 {approx = true} : vector<16x1xf32> -> vector<16x1xf32>
    %39 = vector.broadcast %38 : vector<16x1xf32> to vector<16x128xf32>
    %40 = arith.mulf %35, %39 : vector<16x128xf32>
    %41 = arith.truncf %40 : vector<16x128xf32> to vector<16x128xbf16>
    %c0_25 = arith.constant 0 : index
    %c0_26 = arith.constant 0 : index
    %42 = vector.load %arg10[%c0_25, %c0_26] : memref<16x128xbf16, #tpu.memory_space<vmem>>, vector<16x128xbf16>
    tpu.vector_store %arg10[%c0_25, %c0_26], %41 {strides = array<i32>} : memref<16x128xbf16, #tpu.memory_space<vmem>>, vector<16x128xbf16>,
    return
  }
  func.func @transform_0(%arg0: i32) -> (i32, i32) {
    %c0_i32 = arith.constant 0 : i32
    %c0_i32_0 = arith.constant 0 : i32
    return %arg0, %c0_i32 : i32, i32
  }
  func.func @transform_1(%arg0: i32) -> (i32, i32) {
    %c0_i32 = arith.constant 0 : i32
    %c0_i32_0 = arith.constant 0 : i32
    %c0_i32_1 = arith.constant 0 : i32
    return %c0_i32, %c0_i32_0 : i32, i32
  }
  func.func @transform_2(%arg0: i32) -> (i32, i32) {
    %c0_i32 = arith.constant 0 : i32
    %c0_i32_0 = arith.constant 0 : i32
    %c0_i32_1 = arith.constant 0 : i32
    return %c0_i32, %c0_i32_0 : i32, i32
  }
  func.func @transform_3(%arg0: i32) -> (i32, i32) {
    %c0_i32 = arith.constant 0 : i32
    %c0_i32_0 = arith.constant 0 : i32
    %c0_i32_1 = arith.constant 0 : i32
    return %c0_i32, %c0_i32_0 : i32, i32
  }
  func.func @transform_4(%arg0: i32) -> (i32, i32) {
    %c0_i32 = arith.constant 0 : i32
    %c0_i32_0 = arith.constant 0 : i32
    %c0_i32_1 = arith.constant 0 : i32
    return %c0_i32, %c0_i32_0 : i32, i32
  }
  func.func @transform_5(%arg0: i32) -> (i32, i32) {
    %c0_i32 = arith.constant 0 : i32
    %c0_i32_0 = arith.constant 0 : i32
    %c0_i32_1 = arith.constant 0 : i32
    return %c0_i32, %c0_i32_0 : i32, i32
  }
  func.func @transform_6(%arg0: i32) -> (i32, i32) {
    %c0_i32 = arith.constant 0 : i32
    %c0_i32_0 = arith.constant 0 : i32
    %c0_i32_1 = arith.constant 0 : i32
    return %c0_i32, %c0_i32_0 : i32, i32
  }
  func.func @transform_7(%arg0: i32) -> (i32, i32) {
    %c0_i32 = arith.constant 0 : i32
    %c0_i32_0 = arith.constant 0 : i32
    %c0_i32_1 = arith.constant 0 : i32
    return %c0_i32, %c0_i32_0 : i32, i32
  }
  func.func @transform_8(%arg0: i32) -> (i32, i32) {
    %c0_i32 = arith.constant 0 : i32
    %c0_i32_0 = arith.constant 0 : i32
    %c0_i32_1 = arith.constant 0 : i32
    return %c0_i32, %c0_i32_0 : i32, i32
  }
  func.func @transform_9(%arg0: i32) -> (i32, i32) {
    %c0_i32 = arith.constant 0 : i32
    %c0_i32_0 = arith.constant 0 : i32
    return %arg0, %c0_i32 : i32, i32
  }
}

</mosaic_0001>

<bundles_post_ra>
// kernel: tpu_custom_call.1
= control target key start
LH: loop header
LB: loop body
LE: loop exit
PB: predicated region body
PF: predicated region fallthrough
CT: control target
= control target key end

     0   :  { %v553_v1 = vmov 0.0   ;;  %vm554_vm0 = vmmov 0   ;;  %vm60_vm1 = vcmask 261120   ;;  %s704_s0 = inlined_call_operand.vmem [shape: f32[16,32], index: 0, kind: input, shape index: {}]   ;;  %s705_s1 = inlined_call_operand.vmem [shape: bf16[32,96], index: 1, kind: input, shape index: {}]   ;;  %s706_s2 = inlined_call_operand.vmem [shape: f32[1,96], index: 2, kind: input, shape index: {}]   ;;  %s707_s3 = inlined_call_operand.vmem [shape: bf16[96,64], index: 3, kind: input, shape index: {}]   ;;  %s708_s4 = inlined_call_operand.vmem [shape: f32[1,64], index: 4, kind: input, shape index: {}]   ;;  %s709_s5 = inlined_call_operand.vmem [shape: bf16[64,32], index: 5, kind: input, shape index: {}]   ;;  %s710_s6 = inlined_call_operand.vmem [shape: f32[1,32], index: 6, kind: input, shape index: {}]   ;;  %s711_s7 = inlined_call_operand.vmem [shape: bf16[32,128], index: 7, kind: input, shape index: {}]   ;;  %s712_s8 = inlined_call_operand.vmem [shape: f32[1,128], index: 8, kind: input, shape index: {}]   ;;  %s713_s9 = inlined_call_operand.hbm [shape: bf16[16,128], index: 9, kind: output, shape index: {}]  }
   0x1   :  { %v507_v0 = vld [vmem:[%s705_s1] sm:$0xff]   ;;  %458 = vmatprep.subr.bf16.mxu0 %v553_v1  ;;  %v508_v2 = vld [vmem:[%s705_s1 + $0x8] sm:$0xff]   ;;  %466 = vmatprep.subr.bf16.mxu1 %v553_v1  ;;  %v511_v8 = vld [vmem:[%s707_s3 + $0x10] sm:$0xff]  }
   0x2   :  { %459 = vmatpush3.bf16.msra.mxu0 %v507_v0  ;;  %462 = vmatprep.mubr.msk.bf16.mxu0 %vm554_vm0, %v553_v1  ;;  %v34_v3 = vld [vmem:[%s704_s0] sm:$0xff]  ;;  %v35_v4 = vld [vmem:[%s704_s0 + $0x8] sm:$0xff] }
   0x3   :  { %460 = vmatprep.subr.bf16.mxu0 %v553_v1  ;;  %v509_v5 = vld [vmem:[%s707_s3] sm:$0xff]   ;;  %478 = vmatprep.mubr.msk.bf16.mxu1 %vm554_vm0, %v553_v1  ;;  %v36_v6 = vpack.c.bf16 %v35_v4, %v34_v3  ;;  %v510_v7 = vld [vmem:[%s707_s3 + $0x8] sm:$0xff]  }
   0x4   :  { %467 = vmatpush3.bf16.msra.mxu1 %v509_v5 }
   0x5   :  { %468 = vmatprep.subr.bf16.mxu1 %v553_v1 }
   0x6   :  { %461 = vmatpush3.bf16.msra.mxu0 %v508_v2 }
   0x7   :  { %482 = vmatprep.subr.bf16.mxu0 %v553_v1 }
   0x8   :  { %469 = vmatpush3.bf16.msra.mxu1 %v510_v7 }
   0x9   :  { %463 = vmatmul.mubr.msk.bf16.vlgmr.msra.gmra.mrb[0].mxu0 %vm60_vm1, %v36_v6  ;;  %470 = vmatprep.subr.bf16.mxu1 %v553_v1 }
   0xa   :  { %490 = vmatprep.mubr.msk.bf16.mxu0 %vm554_vm0, %v553_v1 }
   0xb   :  { %14 = vsyncpa [#allocation3], 0  ;;  %v512_v9 = vld [vmem:[%s707_s3 + $0x18] sm:$0xff]   ;;  %v513_v10 = vld [vmem:[%s707_s3 + $0x20] sm:$0xff]   ;;  %vm163_vm2 = vcmask 785408   ;;  %vm250_vm3 = vcmask 523264  }
   0xc   :  { %471 = vmatpush3.bf16.msra.mxu1 %v511_v8  ;;  %v514_v11 = vld [vmem:[%s707_s3 + $0x28] sm:$0xff]   ;;  %v515_v12 = vld [vmem:[%s709_s5] sm:$0xff]   ;;  %v517_v24 = vld [vmem:[%s709_s5 + $0x10] sm:$0xff]  }
   0xd   :  { %472 = vmatprep.subr.bf16.mxu1 %v553_v1  ;;  %483 = vmatpush3.bf16.msra.mxu0 %v515_v12  ;;  %v516_v13 = vld [vmem:[%s709_s5 + $0x8] sm:$0xff]   ;;  %v409_v14 = vld [vmem:[%s706_s2] ss:$0 sm:$0xff]  ;;  %v518_v25 = vld [vmem:[%s709_s5 + $0x18] sm:$0xff]  }
   0xe   :  { %484 = vmatprep.subr.bf16.mxu0 %v553_v1  ;;  %v413_v26 = vld [vmem:[%s708_s4] ss:$0 sm:$0xff]  ;;  %v520_v37 = vld [vmem:[%s711_s7 + $0x8] sm:$0xff]  }
   0xf   :  { %v519_v36 = vld [vmem:[%s711_s7] sm:$0xff]  }
  0x10   :  { %473 = vmatpush3.bf16.msra.mxu1 %v512_v9  ;;  %v421_v38 = vld [vmem:[%s710_s6] ss:$0 sm:$0xff]  ;;  %s555_s6 = smov [#allocation2]  }
  0x11   :  { %474 = vmatprep.subr.bf16.mxu1 %v553_v1  ;;  %485 = vmatpush3.bf16.msra.mxu0 %v516_v13  ;;  %v427_v48 = vld [vmem:[%s712_s8] ss:$0 sm:$0xff]  ;;  %s398_s7 = sshll.u32 %s555_s6, 4  ;;  %s399_s7 = int_to_ptr.vmem [resolvable:$true] %s398_s7 }
  0x12   :  { %486 = vmatprep.subr.bf16.mxu0 %v553_v1  ;;  %s529_s8 = scalar_lea.vmem %s399_s7, 128  ;;  %p534_p1 = scmp.lt.s32.totalorder %s399_s7, %s399_s7 }
  0x13   :  { %p530_p0 = scmp.ne.s32.totalorder %s399_s7, %s529_s8  ;;  %p535_p2 = scmp.lt.s32.totalorder %s529_s8, %s529_s8 }
  0x14   :  { %475 = vmatpush3.bf16.msra.mxu1 %v513_v10 }
  0x15   :  { %476 = vmatprep.subr.bf16.mxu1 %v553_v1  ;;  %487 = vmatpush3.bf16.msra.mxu0 %v517_v24  ;;  %p536_p3 = por %p535_p2, %p534_p1 }
  0x16   :  { %488 = vmatprep.subr.bf16.mxu0 %v553_v1 }
  0x17   :  { %p537_p4 = pnand %p536_p3, %p530_p0 }
  0x18   :  { %477 = vmatpush3.bf16.msra.mxu1 %v514_v11 }
  0x19   :  { %489 = vmatpush3.bf16.msra.mxu0 %v518_v25 }
  0x1a   :  { %494 = vmatprep.subr.bf16.mxu0 %v553_v1 }
  0xdc   :  { %v98_v15 = vpop.f32.mrb[0].mxu0 }
  0xdd   :  { %v99_v16 = vadd.f32 %v409_v14, %v98_v15  ;;  %v464_v17 = vpop.f32.mrb[1].mxu0 }
  0xde   :  { %v101_v18 = vpop.f32.mrb[2].mxu0 }
  0xdf   :  { %v102_v19 = vadd.f32 %v409_v14, %v101_v18  ;;  %v465_v20 = vpop.f32.mrb[3].mxu0  ;;  %v105_v21 = vmax.f32 %v99_v16, 0.0 }
  0xe1   :  { %v106_v22 = vmax.f32 %v102_v19, 0.0 }
  0xe3   :  { %v107_v23 = vpack.c.bf16 %v106_v22, %v105_v21 }
  0xe5   :  { %479 = vmatmul.mubr.msk.bf16.vlgmr.msra.gmra.mrb[0].mxu1 %vm163_vm2, %v107_v23 }
 0x1b8   :  { %v201_v27 = vpop.f32.mrb[0].mxu1 }
 0x1b9   :  { %v202_v28 = vadd.f32 %v413_v26, %v201_v27  ;;  %v480_v29 = vpop.f32.mrb[1].mxu1 }
 0x1ba   :  { %v204_v30 = vpop.f32.mrb[2].mxu1 }
 0x1bb   :  { %v205_v31 = vadd.f32 %v413_v26, %v204_v30  ;;  %v481_v32 = vpop.f32.mrb[3].mxu1  ;;  %v208_v33 = vmax.f32 %v202_v28, 0.0 }
 0x1bd   :  { %v209_v34 = vmax.f32 %v205_v31, 0.0 }
 0x1bf   :  { %v210_v35 = vpack.c.bf16 %v209_v34, %v208_v33 }
 0x1c1   :  { %491 = vmatmul.mubr.msk.bf16.vlgmr.msra.gmra.mrb[4].mxu0 %vm250_vm3, %v210_v35 }
 0x1c2   :  { %498 = vmatprep.mubr.msk.bf16.mxu0 %vm554_vm0, %v553_v1  ;;  %495 = vmatpush3.bf16.msra.mxu0 %v519_v36 }
 0x1c3   :  { %496 = vmatprep.subr.bf16.mxu0 %v553_v1 }
 0x1c6   :  { %497 = vmatpush3.bf16.msra.mxu0 %v520_v37 }
 0x294   :  { %v288_v39 = vpop.f32.mrb[4].mxu0 }
 0x295   :  { %v289_v40 = vadd.f32 %v421_v38, %v288_v39  ;;  %v492_v41 = vpop.f32.mrb[5].mxu0 }
 0x296   :  { %v291_v42 = vpop.f32.mrb[6].mxu0 }
 0x297   :  { %v292_v43 = vadd.f32 %v421_v38, %v291_v42  ;;  %v493_v44 = vpop.f32.mrb[7].mxu0  ;;  %v295_v45 = vmax.f32 %v289_v40, 0.0 }
 0x299   :  { %v296_v46 = vmax.f32 %v292_v43, 0.0 }
 0x29b   :  { %v297_v47 = vpack.c.bf16 %v296_v46, %v295_v45 }
 0x29d   :  { %499 = vmatmul.mubr.msk.bf16.vlgmr.msra.gmra.mrb[8].mxu0 %vm60_vm1, %v297_v47 }
 0x370   :  { %v358_v49 = vpop.f32.mrb[8].mxu0 }
 0x371   :  { %v359_v50 = vadd.f32 %v427_v48, %v358_v49  ;;  %v500_v51 = vpop.f32.mrb[9].mxu0 }
 0x372   :  { %v361_v52 = vpop.f32.mrb[10].mxu0 }
 0x373   :  { %365 = vmax.xlane.f32.xlu0 %v359_v50  ;;  %v501_v53 = vpop.f32.mrb[11].mxu0  ;;  %v362_v54 = vadd.f32 %v427_v48, %v361_v52 }
 0x377   :  { %367 = vmax.xlane.f32.xlu0 %v362_v54 }
 0x400   :  { %v366_v55 = vpop.xlane.xlu0 %365 }
 0x401   :  { %v369_v56 = vsub.f32 %v359_v50, %v366_v55 }
 0x403   :  { %v371_v57 = vmul.f32 1.442695, %v369_v56 }
 0x404   :  { %v368_v58 = vpop.xlane.xlu0 %367 }
 0x405   :  { %521 = vpow2.f32 %v371_v57  ;;  %v370_v59 = vsub.f32 %v362_v54, %v368_v58 }
 0x407   :  { %v373_v60 = vmul.f32 1.442695, %v370_v59 }
 0x409   :  { %523 = vpow2.f32 %v373_v60 }
 0x40f   :  { %v522_v61 = vpop.eup %521 }
 0x410   :  { %375 = vadd.xlane.f32.xlu1 %v522_v61 }
 0x413   :  { %v524_v62 = vpop.eup %523 }
 0x414   :  { %377 = vadd.xlane.f32.xlu1 %v524_v62 }
 0x49d   :  { %v376_v63 = vpop.xlane.xlu1 %375 }
 0x49e   :  { %525 = vrcp.f32 %v376_v63 }
 0x4a1   :  { %v378_v0 = vpop.xlane.xlu1 %377 }
 0x4a2   :  { %527 = vrcp.f32 %v378_v0 }
 0x4a8   :  { %v526_v1 = vpop.eup %525 }
 0x4a9   :  { %v381_v3 = vmul.f32 %v526_v1, %v522_v61 }
 0x4ac   :  { %v528_v2 = vpop.eup %527 }
 0x4ad   :  { %v382_v4 = vmul.f32 %v528_v2, %v524_v62 }
 0x4af   :  { %v438_v5 = vpack.c.bf16 %v382_v4, %v381_v3 }
 0x4b1   :  { %439 = vst [vmem:[#allocation2] sm:$0xff] %v438_v5  }
 0x4b2   :  { %540 = shalt.err (!%p537_p4)
}
 0x4b3   :  { %s541_s22 = scalar_lea.hbm %s713_s9, 128 }
 0x4b4   :  { %p542_p5 = scmp.ne.s32.totalorder %s713_s9, %s541_s22  ;;  %p545_p6 = scmp.lt.u32.totalorder %s541_s22, %s713_s9 }
 0x4b6   :  { %p547_p7 = pnand %p545_p6, %p542_p5 }
 0x4b8   :  { %550 = shalt.err (!%p547_p7)
}
 0x4b9   :  { %s556_s27 = smov 64   ;;  %s557_s28 = smov 4  }
 0x4ba   :  { %404 = dma.vmem_to_hbm [thread:$0]  %s399_s7, 128, %s713_s9, [#allocation3], %s556_s27, %s556_s27, %s557_s28  }
 0x4bb   :  { %551 = dma.done.wait [#allocation3], 128  }
 0x4bc   :  { %552 = vsyncadd [#allocation3], 4294967168 }
 0x4bd   :  { %408 = vsyncpa [#allocation3], 1 }

</bundles_post_ra>
